<compile_context>
chip_gen: v7x
topology: tpu7x:2x2x1
jax: 0.10.0
libtpu: 0.0.40
codegen_flags: <defaults>
</compile_context>

<pallas_src>
import functools

import jax
import jax.numpy as jnp
import numpy as np
from jax.experimental import pallas as pl
from jax.experimental.pallas import tpu as pltpu


# ----------------------------------------------------------------------------
# Fused kernel: last SelfAttention layer + masked-mean pooling, b_tile rows/step
# ----------------------------------------------------------------------------
def _attention_pool_kernel(x_ref, mask_ref, wqT_ref, wkT_ref, wvT_ref,
                           woT_ref, bo_ref, rep_ref, *, num_heads, head_dim):
    B, L, E = x_ref.shape               # block shape: (b_tile, seq_len, emb)
    D = head_dim

    x = x_ref[...]                      # (B, L, E)  compute dtype (f32 or bf16)
    cdt = x.dtype
    mask3 = mask_ref[...]               # (B, 1, L)  f32 {0, 1}
    x2 = x.reshape(B * L, E)            # M = B*L rows per MXU pass

    woT = woT_ref[...]                  # (E, E)
    inv_len = jnp.float32(1.0 / L)
    rep_acc = jnp.zeros((B, E), jnp.float32)

    for h in range(num_heads):          # static python int -> unrolled
        xh = x2 if num_heads == 1 else x2[:, h * D:(h + 1) * D]

        # PyTorch Linear y = x @ W.T ; W.T was pre-computed on the host.
        q = jnp.dot(xh, wqT_ref[...], preferred_element_type=jnp.float32)
        k = jnp.dot(xh, wkT_ref[...], preferred_element_type=jnp.float32)  # scale folded in
        # reference quirk: v = v_linear(q_linear(x))
        v = jnp.dot(q.astype(cdt), wvT_ref[...], preferred_element_type=jnp.float32)

        q3 = q.astype(cdt).reshape(B, L, D)
        k3 = k.astype(cdt).reshape(B, L, D)
        v3 = v.reshape(B, L, D)         # f32

        # energy already carries the 1/sqrt(E) scale (folded into Wk on host).
        energy = jnp.einsum('bqd,bkd->bqk', q3, k3,
                            preferred_element_type=jnp.float32)            # (B, L, L)
        energy = jnp.where(mask3 == 0.0, -1e20, energy)

        m = jnp.max(energy, axis=-1, keepdims=True)
        e = jnp.exp(energy - m)
        denom = jnp.sum(e, axis=-1, keepdims=True)
        r = pl.reciprocal(denom, approx=True)     # EUP slot
        r = r * (2.0 - denom * r)                 # one Newton step -> f32-accurate
        p = e * r                                  # softmax over keys, (B, L, L)

        # Masked-mean pooling over queries BEFORE the value / output matmuls:
        #   sum_q mask_q sum_k p_qk v_kd  =  (mask^T P) V
        w = jnp.einsum('bxq,bqk->bxk', mask3, p,
                       preferred_element_type=jnp.float32)                 # (B, 1, L)
        pooled = jnp.einsum('bxk,bkd->bxd', w, v3,
                            preferred_element_type=jnp.float32)            # (B, 1, D)
        pooled = pooled.reshape(B, D)

        # Per-head partial output projection (no lane-axis concat of heads).
        woT_h = woT if num_heads == 1 else woT[h * D:(h + 1) * D, :]
        rep_acc = rep_acc + jnp.dot(pooled.astype(woT.dtype), woT_h,
                                    preferred_element_type=jnp.float32)    # (B, E)

    # bias term of the pooled projection: bo * (sum_q mask_q) / L
    mask_cnt = jnp.sum(mask3, axis=-1)                                     # (B, 1)
    rep = rep_acc * inv_len + bo_ref[...] * (mask_cnt * inv_len)
    # NOTE: E(=32) < 128 lanes -> this single tiny store is masked; for large
    # workloads rep could be packed batch-major into lanes, but after dropping
    # the (N, L, E) output this write is negligible.
    rep_ref[...] = rep.reshape(B, 1, E).astype(rep_ref.dtype)


def _choose_b_tile(n):
    # Batch rows per grid step so the QKV matmuls see M = b_tile*L rows
    # (fills MXU sublanes), but keep >=2 grid steps when possible so the
    # "parallel" batch axis can shard across TensorCores (v7x: 2 TCs/chip).
    if n >= 32:
        return 16
    return max(1, n // 2)


def self_attention_pool(x, attention_masks, layer_params, num_heads, *,
                        b_tile=None, compute_dtype=jnp.float32):
    """x: (N, L, E); attention_masks: (N, L) of {0,1}. Returns (N, E) f32 rep."""
    N, L, E = x.shape
    assert E % num_heads == 0
    D = E // num_heads
    wq, wk, wv, wo, bo = layer_params

    # Host-side (one-time) weight prep: pre-transpose so the kernel RHS is not
    # transposed, fold the softmax 1/sqrt(E) scale into Wk only.
    scale = 1.0 / (E ** 0.5)
    wqT = wq.T.astype(compute_dtype)
    wkT = (wk * scale).T.astype(compute_dtype)
    wvT = wv.T.astype(compute_dtype)
    woT = wo.T.astype(compute_dtype)
    bo2 = bo.reshape(1, E).astype(jnp.float32)

    if b_tile is None:
        b_tile = _choose_b_tile(N)
    n_tiles = pl.cdiv(N, b_tile)
    n_pad = n_tiles * b_tile

    xin = x.astype(compute_dtype)
    mask = attention_masks.astype(jnp.float32).reshape(N, 1, L)
    if n_pad != N:       # padded rows are fully masked -> rep 0, sliced off below
        xin = jnp.pad(xin, ((0, n_pad - N), (0, 0), (0, 0)))
        mask = jnp.pad(mask, ((0, n_pad - N), (0, 0), (0, 0)))

    kernel = functools.partial(_attention_pool_kernel,
                               num_heads=num_heads, head_dim=D)

    rep = pl.pallas_call(
        kernel,
        out_shape=jax.ShapeDtypeStruct((n_pad, 1, E), jnp.float32),
        grid_spec=pltpu.PrefetchScalarGridSpec(
            num_scalar_prefetch=0,
            grid=(n_tiles,),
            in_specs=[
                pl.BlockSpec((b_tile, L, E), lambda b: (b, 0, 0)),   # x
                pl.BlockSpec((b_tile, 1, L), lambda b: (b, 0, 0)),   # mask (row+pool)
                pl.BlockSpec((D, D), lambda b: (0, 0)),              # Wq^T
                pl.BlockSpec((D, D), lambda b: (0, 0)),              # (Wk*scale)^T
                pl.BlockSpec((D, D), lambda b: (0, 0)),              # Wv^T
                pl.BlockSpec((E, E), lambda b: (0, 0)),              # Wo^T
                pl.BlockSpec((1, E), lambda b: (0, 0)),              # bo
            ],
            out_specs=pl.BlockSpec((b_tile, 1, E), lambda b: (b, 0, 0)),
        ),
        compiler_params=pltpu.CompilerParams(
            dimension_semantics=("parallel",)),
    )(xin, mask, wqT, wkT, wvT, woT, bo2)

    return rep[:N, 0, :]


# ----------------------------------------------------------------------------
# StatementEncoder forward (embedding lookups are glue in plain JAX)
# ----------------------------------------------------------------------------
def statement_encoder_forward(params, input_ids, attention_masks, num_heads, *,
                              b_tile=None, compute_dtype=jnp.float32):
    # On v6e/v7x, compute_dtype=jnp.bfloat16 doubles MXU throughput and halves
    # DMA bytes (f32 accumulation is kept inside the kernel). Default stays f32
    # so the numerical check below is tight (and matches v5e advice).
    N, L = input_ids.shape
    positions = jnp.arange(L)
    x = (params['word_embedding'][input_ids]
         + params['position_embedding'][positions][None, :, :])
    # The reference loop overwrites `output` every iteration and every layer
    # reads the ORIGINAL embeddings, so only the LAST layer affects the result:
    # run exactly one fused attention+pool kernel instead of num_layers calls.
    last_layer = params['layers'][-1]
    return self_attention_pool(x, attention_masks, last_layer, num_heads,
                               b_tile=b_tile, compute_dtype=compute_dtype)


# ----------------------------------------------------------------------------
# Deterministic parameter init (same shapes as the nn.Module __init__)
# ----------------------------------------------------------------------------
def init_params(key, embedding_size, num_layers, vocab_size, max_tokens, num_heads):
    D = embedding_size // num_heads
    keys = jax.random.split(key, 2 + num_layers)
    params = {
        'word_embedding': jax.random.normal(keys[0], (vocab_size, embedding_size), jnp.float32),
        'position_embedding': jax.random.normal(keys[1], (max_tokens, embedding_size), jnp.float32),
        'layers': [],
    }
    for i in range(num_layers):
        lk = jax.random.split(keys[2 + i], 5)
        bd = 1.0 / (D ** 0.5)
        be = 1.0 / (embedding_size ** 0.5)
        wq = jax.random.uniform(lk[0], (D, D), jnp.float32, -bd, bd)
        wk = jax.random.uniform(lk[1], (D, D), jnp.float32, -bd, bd)
        wv = jax.random.uniform(lk[2], (D, D), jnp.float32, -bd, bd)
        wo = jax.random.uniform(lk[3], (embedding_size, embedding_size), jnp.float32, -be, be)
        bo = jax.random.uniform(lk[4], (embedding_size,), jnp.float32, -be, be)
        params['layers'].append((wq, wk, wv, wo, bo))
    return params


# ----------------------------------------------------------------------------
# Pure-JAX reference (mirrors the PyTorch code line by line) for verification
# ----------------------------------------------------------------------------
def reference_forward(params, input_ids, attention_masks, num_heads):
    N, L = input_ids.shape
    E = params['word_embedding'].shape[1]
    D = E // num_heads
    positions = jnp.arange(L)
    x = params['word_embedding'][input_ids] + params['position_embedding'][positions][None]
    out = None
    for (wq, wk, wv, wo, bo) in params['layers']:
        xh = x.reshape(N, L, num_heads, D)
        k = jnp.einsum('nlhd,ed->nlhe', xh, wk)
        q = jnp.einsum('nlhd,ed->nlhe', xh, wq)
        v = jnp.einsum('nlhd,ed->nlhe', q, wv)          # same quirk as reference module
        energy = jnp.einsum('nqhd,nkhd->nhqk', q, k)
        mask = attention_masks[:, None, None, :]
        energy = jnp.where(mask == 0, -1e20, energy)
        p = jax.nn.softmax(energy / (E ** 0.5), axis=3)
        attn = jnp.einsum('nhql,nlhd->nqhd', p, v).reshape(N, L, E)
        out = attn @ wo.T + bo
    masked = out * attention_masks[..., None]
    return jnp.mean(masked, axis=1)


if __name__ == "__main__":
    key = jax.random.PRNGKey(0)
    N, L = 2, 8                       # batch, seq
    embedding_size = 32
    num_heads = 1
    num_layers = 2
    vocab_size = 50
    max_tokens = 16

    k_params, k_ids = jax.random.split(key)
    params = init_params(k_params, embedding_size, num_layers, vocab_size,
                         max_tokens, num_heads)

    input_ids = jax.random.randint(k_ids, (N, L), 0, vocab_size)
    attention_masks = jnp.array([[1, 1, 1, 1, 1, 1, 1, 1],
                                 [1, 1, 1, 1, 1, 0, 0, 0]], dtype=jnp.float32)

    sentence_rep = statement_encoder_forward(params, input_ids, attention_masks, num_heads)
    sentence_rep = jax.block_until_ready(sentence_rep)

    ref = reference_forward(params, input_ids, attention_masks, num_heads)
    assert sentence_rep.shape == (N, embedding_size)
    # Tolerance covers MXU f32 pass differences + EUP reciprocal (Newton-refined).
    np.testing.assert_allclose(np.asarray(sentence_rep), np.asarray(ref),
                               rtol=1e-3, atol=1e-3)

    print("KERNEL_OK")
</pallas_src>

<mosaic_0001>
module attributes {stable_mosaic.version = 11 : i64} {
  func.func @_attention_pool_kernel(%arg0: i32, %arg1: memref<1x8x32xf32, #tpu.memory_space<vmem>>, %arg2: memref<1x1x8xf32, #tpu.memory_space<vmem>>, %arg3: memref<32x32xf32, #tpu.memory_space<vmem>>, %arg4: memref<32x32xf32, #tpu.memory_space<vmem>>, %arg5: memref<32x32xf32, #tpu.memory_space<vmem>>, %arg6: memref<32x32xf32, #tpu.memory_space<vmem>>, %arg7: memref<1x32xf32, #tpu.memory_space<vmem>>, %arg8: memref<1x1x32xf32, #tpu.memory_space<vmem>>) attributes {dimension_semantics = [#tpu.dimension_semantics<parallel>], iteration_bounds = array<i64: 2>, scalar_prefetch = 0 : i64, scratch_operands = 0 : i64, tpu.core_type = #tpu.core_type<tc>, window_params = [{transform_indices = @transform_0, window_bounds = array<i64: 1, 8, 32>}, {transform_indices = @transform_1, window_bounds = array<i64: 1, 1, 8>}, {pipeline_mode = #tpu.pipeline_mode<synchronous>, transform_indices = @transform_2, window_bounds = array<i64: 32, 32>}, {pipeline_mode = #tpu.pipeline_mode<synchronous>, transform_indices = @transform_3, window_bounds = array<i64: 32, 32>}, {pipeline_mode = #tpu.pipeline_mode<synchronous>, transform_indices = @transform_4, window_bounds = array<i64: 32, 32>}, {pipeline_mode = #tpu.pipeline_mode<synchronous>, transform_indices = @transform_5, window_bounds = array<i64: 32, 32>}, {pipeline_mode = #tpu.pipeline_mode<synchronous>, transform_indices = @transform_6, window_bounds = array<i64: 1, 32>}, {transform_indices = @transform_7, window_bounds = array<i64: 1, 1, 32>}]} {
    %c0 = arith.constant 0 : index
    %c0_0 = arith.constant 0 : index
    %c0_1 = arith.constant 0 : index
    %0 = vector.load %arg1[%c0, %c0_0, %c0_1] : memref<1x8x32xf32, #tpu.memory_space<vmem>>, vector<1x8x32xf32>
    %c0_2 = arith.constant 0 : index
    %c0_3 = arith.constant 0 : index
    %c0_4 = arith.constant 0 : index
    %1 = vector.load %arg2[%c0_2, %c0_3, %c0_4] : memref<1x1x8xf32, #tpu.memory_space<vmem>>, vector<1x1x8xf32>
    %2 = vector.shape_cast %0 : vector<1x8x32xf32> to vector<8x32xf32>
    %c0_5 = arith.constant 0 : index
    %c0_6 = arith.constant 0 : index
    %3 = vector.load %arg6[%c0_5, %c0_6] : memref<32x32xf32, #tpu.memory_space<vmem>>, vector<32x32xf32>
    %cst = arith.constant 0.000000e+00 : f32
    %4 = vector.broadcast %cst : f32 to vector<1x32xf32>
    %c0_7 = arith.constant 0 : index
    %c0_8 = arith.constant 0 : index
    %5 = vector.load %arg3[%c0_7, %c0_8] : memref<32x32xf32, #tpu.memory_space<vmem>>, vector<32x32xf32>
    %cst_9 = arith.constant dense<0.000000e+00> : vector<8x32xf32>
    %6 = tpu.matmul %2, %5, %cst_9 {dimension_numbers = #tpu.dot_dimension_numbers<[1], [0], [0], [1], [0, 0, 1, 1], [], []>} : vector<8x32xf32>, vector<32x32xf32>, vector<8x32xf32> -> vector<8x32xf32>
    %c0_10 = arith.constant 0 : index
    %c0_11 = arith.constant 0 : index
    %7 = vector.load %arg4[%c0_10, %c0_11] : memref<32x32xf32, #tpu.memory_space<vmem>>, vector<32x32xf32>
    %cst_12 = arith.constant dense<0.000000e+00> : vector<8x32xf32>
    %8 = tpu.matmul %2, %7, %cst_12 {dimension_numbers = #tpu.dot_dimension_numbers<[1], [0], [0], [1], [0, 0, 1, 1], [], []>} : vector<8x32xf32>, vector<32x32xf32>, vector<8x32xf32> -> vector<8x32xf32>
    %c0_13 = arith.constant 0 : index
    %c0_14 = arith.constant 0 : index
    %9 = vector.load %arg5[%c0_13, %c0_14] : memref<32x32xf32, #tpu.memory_space<vmem>>, vector<32x32xf32>
    %cst_15 = arith.constant dense<0.000000e+00> : vector<8x32xf32>
    %10 = tpu.matmul %6, %9, %cst_15 {dimension_numbers = #tpu.dot_dimension_numbers<[1], [0], [0], [1], [0, 0, 1, 1], [], []>} : vector<8x32xf32>, vector<32x32xf32>, vector<8x32xf32> -> vector<8x32xf32>
    %11 = vector.shape_cast %6 : vector<8x32xf32> to vector<1x8x32xf32>
    %12 = vector.shape_cast %8 : vector<8x32xf32> to vector<1x8x32xf32>
    %13 = vector.shape_cast %10 : vector<8x32xf32> to vector<1x8x32xf32>
    "tpu.trace_start"() <{level = 10 : i32, message = "bqd,bkd->bqk"}> : () -> ()
    %cst_16 = arith.constant dense<0.000000e+00> : vector<1x8x8xf32>
    %14 = tpu.matmul %11, %12, %cst_16 {dimension_numbers = #tpu.dot_dimension_numbers<[2], [2], [1], [1], [0, 0, 0, 1, 1, 1], [0], [0]>} : vector<1x8x32xf32>, vector<1x8x32xf32>, vector<1x8x8xf32> -> vector<1x8x8xf32>
    %cst_17 = arith.constant 0.000000e+00 : f32
    "tpu.trace_stop"() : () -> ()
    %15 = vector.broadcast %cst_17 : f32 to vector<1x1x8xf32>
    %16 = arith.cmpf oeq, %1, %15 : vector<1x1x8xf32>
    %cst_18 = arith.constant -1.000000e+20 : f32
    %17 = vector.shape_cast %16 : vector<1x1x8xi1> to vector<1x1x8xi1>
    %18 = vector.broadcast %17 : vector<1x1x8xi1> to vector<1x8x8xi1>
    %19 = vector.broadcast %cst_18 : f32 to vector<1x8x8xf32>
    %20 = arith.select %18, %19, %14 : vector<1x8x8xi1>, vector<1x8x8xf32>
    %cst_19 = arith.constant dense<0xFF800000> : vector<1x8xf32>
    %21 = vector.multi_reduction <maximumf>, %20, %cst_19 [2] : vector<1x8x8xf32> to vector<1x8xf32>
    %22 = vector.shape_cast %21 : vector<1x8xf32> to vector<1x8x1xf32>
    %23 = vector.broadcast %22 : vector<1x8x1xf32> to vector<1x8x8xf32>
    %24 = arith.subf %20, %23 : vector<1x8x8xf32>
    %25 = math.exp %24 : vector<1x8x8xf32>
    %cst_20 = arith.constant dense<0.000000e+00> : vector<1x8xf32>
    %26 = vector.multi_reduction <add>, %25, %cst_20 [2] : vector<1x8x8xf32> to vector<1x8xf32>
    %27 = vector.shape_cast %26 : vector<1x8xf32> to vector<1x8x1xf32>
    %28 = tpu.reciprocal %27 {approx = true} : vector<1x8x1xf32> -> vector<1x8x1xf32>
    %29 = arith.mulf %27, %28 : vector<1x8x1xf32>
    %cst_21 = arith.constant 2.000000e+00 : f32
    %30 = vector.broadcast %cst_21 : f32 to vector<1x8x1xf32>
    %31 = arith.subf %30, %29 : vector<1x8x1xf32>
    %32 = arith.mulf %28, %31 : vector<1x8x1xf32>
    %33 = vector.broadcast %32 : vector<1x8x1xf32> to vector<1x8x8xf32>
    %34 = arith.mulf %25, %33 : vector<1x8x8xf32>
    "tpu.trace_start"() <{level = 10 : i32, message = "bxq,bqk->bxk"}> : () -> ()
    %cst_22 = arith.constant dense<0.000000e+00> : vector<1x1x8xf32>
    %35 = tpu.matmul %1, %34, %cst_22 {dimension_numbers = #tpu.dot_dimension_numbers<[2], [1], [1], [2], [0, 0, 0, 1, 1, 2], [0], [0]>} : vector<1x1x8xf32>, vector<1x8x8xf32>, vector<1x1x8xf32> -> vector<1x1x8xf32>
    "tpu.trace_stop"() : () -> ()
    "tpu.trace_start"() <{level = 10 : i32, message = "bxk,bkd->bxd"}> : () -> ()
    %cst_23 = arith.constant dense<0.000000e+00> : vector<1x1x32xf32>
    %36 = tpu.matmul %35, %13, %cst_23 {dimension_numbers = #tpu.dot_dimension_numbers<[2], [1], [1], [2], [0, 0, 0, 1, 1, 2], [0], [0]>} : vector<1x1x8xf32>, vector<1x8x32xf32>, vector<1x1x32xf32> -> vector<1x1x32xf32>
    "tpu.trace_stop"() : () -> ()
    %37 = vector.shape_cast %36 : vector<1x1x32xf32> to vector<1x32xf32>
    %cst_24 = arith.constant dense<0.000000e+00> : vector<1x32xf32>
    %38 = tpu.matmul %37, %3, %cst_24 {dimension_numbers = #tpu.dot_dimension_numbers<[1], [0], [0], [1], [0, 0, 1, 1], [], []>} : vector<1x32xf32>, vector<32x32xf32>, vector<1x32xf32> -> vector<1x32xf32>
    %39 = arith.addf %4, %38 : vector<1x32xf32>
    %cst_25 = arith.constant dense<0.000000e+00> : vector<1x1xf32>
    %40 = vector.multi_reduction <add>, %1, %cst_25 [2] : vector<1x1x8xf32> to vector<1x1xf32>
    %cst_26 = arith.constant 1.250000e-01 : f32
    %41 = vector.broadcast %cst_26 : f32 to vector<1x32xf32>
    %42 = arith.mulf %39, %41 : vector<1x32xf32>
    %c0_27 = arith.constant 0 : index
    %c0_28 = arith.constant 0 : index
    %43 = vector.load %arg7[%c0_27, %c0_28] : memref<1x32xf32, #tpu.memory_space<vmem>>, vector<1x32xf32>
    %cst_29 = arith.constant 1.250000e-01 : f32
    %44 = vector.broadcast %cst_29 : f32 to vector<1x1xf32>
    %45 = arith.mulf %40, %44 : vector<1x1xf32>
    %46 = vector.broadcast %45 : vector<1x1xf32> to vector<1x32xf32>
    %47 = arith.mulf %43, %46 : vector<1x32xf32>
    %48 = arith.addf %42, %47 : vector<1x32xf32>
    %49 = vector.shape_cast %48 : vector<1x32xf32> to vector<1x1x32xf32>
    %c0_30 = arith.constant 0 : index
    %c0_31 = arith.constant 0 : index
    %c0_32 = arith.constant 0 : index
    %50 = vector.load %arg8[%c0_30, %c0_31, %c0_32] : memref<1x1x32xf32, #tpu.memory_space<vmem>>, vector<1x1x32xf32>
    tpu.vector_store %arg8[%c0_30, %c0_31, %c0_32], %49 {strides = array<i32>} : memref<1x1x32xf32, #tpu.memory_space<vmem>>, vector<1x1x32xf32>,
    return
  }
  func.func @transform_0(%arg0: i32) -> (i32, i32, i32) {
    %c0_i32 = arith.constant 0 : i32
    %c0_i32_0 = arith.constant 0 : i32
    %c0_i32_1 = arith.constant 0 : i32
    return %arg0, %c0_i32, %c0_i32_0 : i32, i32, i32
  }
  func.func @transform_1(%arg0: i32) -> (i32, i32, i32) {
    %c0_i32 = arith.constant 0 : i32
    %c0_i32_0 = arith.constant 0 : i32
    %c0_i32_1 = arith.constant 0 : i32
    return %arg0, %c0_i32, %c0_i32_0 : i32, i32, i32
  }
  func.func @transform_2(%arg0: i32) -> (i32, i32) {
    %c0_i32 = arith.constant 0 : i32
    %c0_i32_0 = arith.constant 0 : i32
    %c0_i32_1 = arith.constant 0 : i32
    return %c0_i32, %c0_i32_0 : i32, i32
  }
  func.func @transform_3(%arg0: i32) -> (i32, i32) {
    %c0_i32 = arith.constant 0 : i32
    %c0_i32_0 = arith.constant 0 : i32
    %c0_i32_1 = arith.constant 0 : i32
    return %c0_i32, %c0_i32_0 : i32, i32
  }
  func.func @transform_4(%arg0: i32) -> (i32, i32) {
    %c0_i32 = arith.constant 0 : i32
    %c0_i32_0 = arith.constant 0 : i32
    %c0_i32_1 = arith.constant 0 : i32
    return %c0_i32, %c0_i32_0 : i32, i32
  }
  func.func @transform_5(%arg0: i32) -> (i32, i32) {
    %c0_i32 = arith.constant 0 : i32
    %c0_i32_0 = arith.constant 0 : i32
    %c0_i32_1 = arith.constant 0 : i32
    return %c0_i32, %c0_i32_0 : i32, i32
  }
  func.func @transform_6(%arg0: i32) -> (i32, i32) {
    %c0_i32 = arith.constant 0 : i32
    %c0_i32_0 = arith.constant 0 : i32
    %c0_i32_1 = arith.constant 0 : i32
    return %c0_i32, %c0_i32_0 : i32, i32
  }
  func.func @transform_7(%arg0: i32) -> (i32, i32, i32) {
    %c0_i32 = arith.constant 0 : i32
    %c0_i32_0 = arith.constant 0 : i32
    %c0_i32_1 = arith.constant 0 : i32
    return %arg0, %c0_i32, %c0_i32_0 : i32, i32, i32
  }
}

</mosaic_0001>

<bundles_post_ra>
// kernel: tpu_custom_call.1
= control target key start
LH: loop header
LB: loop body
LE: loop exit
PB: predicated region body
PF: predicated region fallthrough
CT: control target
= control target key end

     0   :  { %12 = vsyncpa [#allocation3], 0  ;;  %s1893_s0 = inlined_call_operand.hbm [shape: f32[2,8,32], index: 0, kind: input, shape index: {}]   ;;  %s1894_s1 = inlined_call_operand.vmem [shape: f32[2,1,8], index: 1, kind: input, shape index: {}]   ;;  %s1895_s2 = inlined_call_operand.hbm [shape: f32[32,32], index: 2, kind: input, shape index: {}]   ;;  %s1896_s3 = inlined_call_operand.hbm [shape: f32[32,32], index: 3, kind: input, shape index: {}]   ;;  %s1897_s4 = inlined_call_operand.hbm [shape: f32[32,32], index: 4, kind: input, shape index: {}]   ;;  %s1898_s5 = inlined_call_operand.hbm [shape: f32[32,32], index: 5, kind: input, shape index: {}]   ;;  %s1899_s6 = inlined_call_operand.vmem [shape: f32[1,32], index: 6, kind: input, shape index: {}]   ;;  %s1900_s7 = inlined_call_operand.hbm [shape: f32[2,1,32], index: 7, kind: output, shape index: {}]  }
   0x1   :  { %14 = vsyncpa [#allocation3 + $0x1], 0 }
   0x2   :  { %15 = vsyncpa [#allocation6], 0 }
   0x3   :  { %16 = vsyncpa [#allocation9], 0 }
   0x4   :  { %17 = vsyncpa [#allocation4], 0 }
   0x5   :  { %19 = vsyncpa [#allocation4 + $0x1], 0  ;;  %s1554_s24 = smov 0   ;;  %s1556_s25 = smov 0  }
   0x6   :  { %s1558_s26 = smov 0   ;;  %s1560_s27 = smov 0  }
   0x7 LB: > { %s1502_s28 = smov [#allocation5]   ;;  %s1575_s30 = sadd.s32 4294967295, %s1500_s27   ;;  %s1500_s27 = sphi %s1560_s27, %s1924_s27   ;;  %s1496_s26 = sphi %s1558_s26, %s1923_s26   ;;  %s1492_s25 = sphi %s1556_s25, %s1922_s25   ;;  %s1488_s24 = sphi %s1554_s24, %s1921_s24  }
   0x8   : > { %s225_s29 = sshll.u32 %s1502_s28, 4  ;;  %p1053_p0 = scmp.ge.s32.totalorder %s1500_s27, 1  ;;  %s1580_s29 = int_to_ptr.vmem [resolvable:$true] %s225_s29 }
   0x9   : > { %p1901_p1 = scmp.eq.s32.totalorder %s1575_s30, 0  ;;  %p213_p2 = scmp.lt.s32.totalorder %s1500_s27, 3 }
   0xa   : > { %s1503_s9 = smov [#allocation8]   ;;  %s1504_s12 = smov [#allocation7]  }
   0xb   : > { %p1582_p3 = pnand %p1053_p0, %p213_p2  ;;  %s251_s10 = sshll.u32 %s1503_s9, 4  ;;  %s1595_s10 = int_to_ptr.vmem [resolvable:$true] %s251_s10 }
   0xc   : > { %s238_s13 = sshll.u32 %s1504_s12, 4  ;;  %s1284_s16 = scalar_lea.hbm %s1895_s2, 512  ;;  %s1597_s13 = int_to_ptr.vmem [resolvable:$true] %s238_s13 }
   0xd   : > { %s1904_s8 = scalar_select %p1582_p3, 1, 0 }
   0xe   : > { %p1207_p5 = pneg %p1582_p3  ;;  %p1285_p7 = scmp.ne.s32.totalorder %s1895_s2, %s1284_s16 }
   0xf   : > { %p1291_p11 = scmp.lt.u32.totalorder %s1284_s16, %s1895_s2 }
  0x10   : > { %p1591_p6 = pnand %p1207_p5, %p1901_p1 }
  0x12   : > { %p1607_p8 = pneg %p1591_p6 }
  0x14   : > { %p1287_p9 = pnand %p1607_p8, %p1285_p7 }
  0x16   : > { %p1288_p10 = pneg %p1287_p9 }
  0x18   : > { %p1293_p12 = pnand %p1291_p11, %p1288_p10 }
  0x1a   : > { %1296 = shalt.err (!%p1293_p12)
}
  0x1b   : > { %s1297_s22 = scalar_lea.vmem %s1580_s29, 512  ;;  %p1305_p5 = scmp.lt.s32.totalorder %s1580_s29, %s1580_s29 }
  0x1c   : > { %p1298_p13 = scmp.ne.s32.totalorder %s1580_s29, %s1297_s22  ;;  %p1306_p4 = scmp.lt.s32.totalorder %s1297_s22, %s1297_s22 }
  0x1e   : > { %p1300_p0 = pnand %p1298_p13, %p1607_p8  ;;  %p1307_p7 = por %p1306_p4, %p1305_p5 }
  0x20   : > { %p1301_p2 = pneg %p1300_p0 }
  0x22   : > { %p1308_p9 = pnand %p1307_p7, %p1301_p2 }
  0x24   : > { %1311 = shalt.err (!%p1308_p9)
}
  0x25   : > { %s1505_s23 = smov 128   ;;  %s1506_s28 = smov 8  }
  0x26   : > { %1210 = dma.hbm_to_vmem [thread:$0]  (!%p1591_p6), %s1895_s2, 512, %s1580_s29, [#allocation6], %s1505_s23, %s1505_s23, %s1506_s28  }
  0x27   : > { %s1312_s16 = scalar_lea.hbm %s1897_s4, 512 }
  0x28   : > { %p1313_p4 = scmp.ne.s32.totalorder %s1897_s4, %s1312_s16  ;;  %p1319_p12 = scmp.lt.u32.totalorder %s1312_s16, %s1897_s4 }
  0x2a   : > { %p1315_p10 = pnand %p1313_p4, %p1607_p8 }
  0x2c   : > { %p1316_p11 = pneg %p1315_p10 }
  0x2e   : > { %p1321_p13 = pnand %p1319_p12, %p1316_p11 }
  0x30   : > { %1324 = shalt.err (!%p1321_p13)
}
  0x31   : > { %s1325_s29 = scalar_lea.vmem %s1595_s10, 512  ;;  %p1333_p7 = scmp.lt.s32.totalorder %s1595_s10, %s1595_s10 }
  0x32   : > { %p1326_p0 = scmp.ne.s32.totalorder %s1595_s10, %s1325_s29  ;;  %p1334_p9 = scmp.lt.s32.totalorder %s1325_s29, %s1325_s29 }
  0x34   : > { %p1328_p2 = pnand %p1326_p0, %p1607_p8  ;;  %p1335_p4 = por %p1334_p9, %p1333_p7 }
  0x36   : > { %p1329_p5 = pneg %p1328_p2 }
  0x38   : > { %p1336_p10 = pnand %p1335_p4, %p1329_p5 }
  0x3a   : > { %1339 = shalt.err (!%p1336_p10)
}
  0x3b   : > { %1216 = dma.hbm_to_vmem [thread:$0]  (!%p1591_p6), %s1897_s4, 512, %s1595_s10, [#allocation9], %s1505_s23, %s1505_s23, %s1506_s28  }
  0x3c   : > { %s1340_s15 = scalar_lea.hbm %s1896_s3, 512 }
  0x3d   : > { %p1341_p11 = scmp.ne.s32.totalorder %s1896_s3, %s1340_s15  ;;  %p1347_p0 = scmp.lt.u32.totalorder %s1340_s15, %s1896_s3 }
  0x3f   : > { %p1343_p12 = pnand %p1341_p11, %p1607_p8 }
  0x41   : > { %p1344_p13 = pneg %p1343_p12 }
  0x43   : > { %p1349_p2 = pnand %p1347_p0, %p1344_p13 }
  0x45   : > { %1352 = shalt.err (!%p1349_p2)
}
  0x46   : > { %s1353_s10 = scalar_lea.vmem %s1597_s13, 512  ;;  %p1361_p4 = scmp.lt.s32.totalorder %s1597_s13, %s1597_s13 }
  0x47   : > { %p1354_p5 = scmp.ne.s32.totalorder %s1597_s13, %s1353_s10  ;;  %p1362_p10 = scmp.lt.s32.totalorder %s1353_s10, %s1353_s10 }
  0x49   : > { %p1356_p7 = pnand %p1354_p5, %p1607_p8  ;;  %p1363_p11 = por %p1362_p10, %p1361_p4 }
  0x4b   : > { %p1357_p9 = pneg %p1356_p7 }
  0x4d   : > { %p1364_p12 = pnand %p1363_p11, %p1357_p9 }
  0x4f   : > { %1367 = shalt.err (!%p1364_p12)
}
  0x50   : > { %1213 = dma.hbm_to_vmem [thread:$0]  (!%p1591_p6), %s1896_s3, 512, %s1597_s13, [#allocation6], %s1505_s23, %s1505_s23, %s1506_s28  }
  0x51   : > { %s1507_s22 = smov [#allocation10]   ;;  %s1368_s15 = scalar_lea.hbm %s1898_s5, 512 }
  0x52   : > { %s264_s9 = sshll.u32 %s1507_s22, 4  ;;  %p1369_p13 = scmp.ne.s32.totalorder %s1898_s5, %s1368_s15  ;;  %s265_s9 = int_to_ptr.vmem [resolvable:$true] %s264_s9 }
  0x53   : > { %p1375_p5 = scmp.lt.u32.totalorder %s1368_s15, %s1898_s5 }
  0x54   : > { %p1371_p0 = pnand %p1369_p13, %p1607_p8 }
  0x56   : > { %p1372_p2 = pneg %p1371_p0 }
  0x58   : > { %p1377_p7 = pnand %p1375_p5, %p1372_p2 }
  0x5a   : > { %1380 = shalt.err (!%p1377_p7)
}
  0x5b   : > { %s1381_s13 = scalar_lea.vmem %s265_s9, 512  ;;  %p1389_p11 = scmp.lt.s32.totalorder %s265_s9, %s265_s9 }
  0x5c   : > { %p1382_p9 = scmp.ne.s32.totalorder %s265_s9, %s1381_s13  ;;  %p1390_p12 = scmp.lt.s32.totalorder %s1381_s13, %s1381_s13 }
  0x5e   : > { %p1384_p4 = pnand %p1382_p9, %p1607_p8  ;;  %p1391_p1 = por %p1390_p12, %p1389_p11 }
  0x60   : > { %p1385_p10 = pneg %p1384_p4 }
  0x62   : > { %p1392_p3 = pnand %p1391_p1, %p1385_p10 }
  0x64   : > { %1395 = shalt.err (!%p1392_p3)
}
  0x65   : > { %1219 = dma.hbm_to_vmem [thread:$0]  (!%p1591_p6), %s1898_s5, 512, %s265_s9, [#allocation9], %s1505_s23, %s1505_s23, %s1506_s28  }
  0x66   : > { %s1052_s11 = sadd.s32 4294967294, %s1500_s27   ;;  %s1706_s19 = sadd.s32 1, %s1500_s27  }
  0x67   : > { %s29_s29 = ssub.s32 %s1500_s27, %s1706_s19  ;;  %s32_s22 = sadd.s32 1, %s1496_s26 }
  0x68   : > { %p30_p1 = scmp.eq.s32.totalorder %s29_s29, 0  ;;  %p39_p3 = scmp.ne.s32.totalorder %s1496_s26, %s1492_s25 }
  0x69   : > { %p40_p8 = scmp.eq.s32.totalorder %s1500_s27, 0  ;;  %p45_p13 = scmp.ne.s32.totalorder %s1492_s25, %s1488_s24 }
  0x6a   : > { %s1717_s12 = scalar_select %p30_p1, %s1496_s26, %s32_s22  }
  0x6b   : > { %p1719_p0 = por %p40_p8, %p39_p3  ;;  %p1908_p2 = scmp.eq.s32.totalorder %s1575_s30, 0 }
  0x6c   : > { %p200_p5 = scmp.eq.s32.totalorder %s1575_s30, 1  ;;  %p206_p7 = scmp.eq.s32.totalorder %s1052_s11, 1 }
  0x6d   : > { %p1725_p6 = por %p1908_p2, %p45_p13  ;;  %p1232_p9 = scmp.lt.s32.totalorder %s1500_s27, 2 }
  0x6e   : > { %s281_s28 = sand.u32 1, %s1496_s26   ;;  %p1732_p4 = por %p200_p5, %p39_p3 }
  0x6f   : > { %p1736_p10 = por %p206_p7, %p45_p13  ;;  %s1059_s16 = sshll.u32 %s281_s28, 3 }
  0x70   : > { %s1910_s9 = scalar_select %p1732_p4, 1, 0 }
  0x71   : > { %s1911_s15 = scalar_select %p1736_p10, 1, 0 }
  0x72   : > { %s1060_s17 = sshll.u32 %s1500_s27, 7  ;;  %s285_s10 = scalar_lea.vmem [#allocation2], %s1059_s16 }
  0x73   : > { %s1744_s13 = scalar_lea.hbm %s1893_s0, %s1060_s17  ;;  %s292_s21 = sshll.u32 %s285_s10, 4  ;;  %s1746_s21 = int_to_ptr.vmem [resolvable:$true] %s292_s21 }
  0x74   : > { %p1750_p11 = pnand %p1232_p9, %p1719_p0  ;;  %s282_s29 = scalar_lea.sflag [#allocation3], %s281_s28 }
  0x75   : > { %s1396_s22 = scalar_lea.hbm %s1744_s13, 128  ;;  %s1401_s18 = scalar_lea.hbm %s1893_s0, 256 }
  0x76   : > { %p1397_p12 = scmp.ne.s32.totalorder %s1744_s13, %s1396_s22  ;;  %p1398_p1 = pneg %p1750_p11 }
  0x77   : > { %p1402_p13 = scmp.lt.u32.totalorder %s1744_s13, %s1893_s0  ;;  %p1403_p0 = scmp.lt.u32.totalorder %s1401_s18, %s1396_s22 }
  0x78   : > { %p1399_p3 = pnand %p1398_p1, %p1397_p12  ;;  %p1405_p5 = scmp.lt.u32.totalorder %s1396_s22, %s1744_s13 }
  0x79   : > { %p1404_p2 = por %p1403_p0, %p1402_p13 }
  0x7a   : > { %p1400_p8 = pneg %p1399_p3 }
  0x7b   : > { %p1406_p7 = por %p1405_p5, %p1404_p2 }
  0x7d   : > { %p1407_p9 = pnand %p1406_p7, %p1400_p8 }
  0x7f   : > { %1410 = shalt.err (!%p1407_p9)
}
  0x80   : > { %s1411_s28 = scalar_lea.vmem %s1746_s21, 128  ;;  %s1508_s10 = smov [#allocation2]  }
  0x81   : > { %p1412_p12 = scmp.ne.s32.totalorder %s1746_s21, %s1411_s28  ;;  %s1416_s16 = sshll.u32 %s1508_s10, 4  ;;  %s1417_s16 = int_to_ptr.vmem [resolvable:$false] %s1416_s16 }
  0x82   : > { %s1418_s17 = scalar_lea.vmem %s1417_s16, 256  ;;  %p1419_p4 = scmp.lt.s32.totalorder %s1746_s21, %s1417_s16 }
  0x83   : > { %p1414_p3 = pnand %p1412_p12, %p1398_p1  ;;  %p1420_p13 = scmp.lt.s32.totalorder %s1418_s17, %s1411_s28 }
  0x85   : > { %p1415_p10 = pneg %p1414_p3  ;;  %p1421_p0 = por %p1420_p13, %p1419_p4 }
  0x87   : > { %p1422_p2 = pnand %p1421_p0, %p1415_p10 }
  0x89   : > { %1425 = shalt.err (!%p1422_p2)
}
  0x8a   : > { %1223 = dma.hbm_to_vmem [thread:$0]  (!%p1750_p11), %s1744_s13, 128, %s1746_s21, %s282_s29  }
  0x8b   : > { %p1913_p8 = scmp.ne.s32.totalorder %s1904_s8, 0 }
  0x8c   : > { %s1782_s22 = sand.u32 (!%p1913_p8), 1, %s1492_s25  }
  0x8d   : > { %307 = sbr.rel (%p1913_p8) target bundleno = 1568 (0x620), region = 48  ;;  %s1062_s18 = sshll.u32 (!%p1913_p8), %s1782_s22, 3 }
  0x8e   : > { %s310_s14 = scalar_lea.sflag (!%p1913_p8), [#allocation3], %s1782_s22  ;;  %s1786_s20 = scalar_lea.vmem (!%p1913_p8), [#allocation2], %s1062_s18 }
  0x94   : > { %1471 = dma.done.wait (%p1725_p6), %s310_s14, 128  }
  0x95   : > { %1473 = vsyncadd (%p1725_p6), %s310_s14, 4294967168  ;;  %p1914_p4 = scmp.eq.s32.totalorder %s1575_s30, 0 }
  0x97   : > { %1475 = dma.done.wait (%p1914_p4), [#allocation6], 1024   ;;  %p1915_p10 = pmov %p1914_p4 }
  0x98   : > { %p1916_p11 = pmov %p1914_p4 }
  0x99   : > { %1477 = vsyncadd (%p1915_p10), [#allocation6], 4294966272 }
  0x9a   : > { %1479 = dma.done.wait (%p1916_p11), [#allocation9], 1024   ;;  %p1917_p1 = pmov %p1914_p4 }
  0x9b   : > { %v1509_v0 = vmov 0.0|0.0   ;;  %vm1510_vm0 = vmmov 0   ;;  %v1511_v1 = vmov 0.0   ;;  %v449_v2 = vld [vmem:[#allocation7] sm:$0xff]  ;;  %v450_v3 = vld [vmem:[#allocation7 + $0x8] sm:$0xff]  ;;  %v451_v7 = vld [vmem:[#allocation7 + $0x10] sm:$0xff]  ;;  %v675_v25 = vlaneseq }
  0x9c   : > { %1481 = vsyncadd (%p1917_p1), [#allocation9], 4294966272  ;;  %1169 = vmatprep.subr.bf16.mxu1 %v1509_v0  ;;  %1163 = vmatprep.subr.bf16.mxu0 %v1509_v0  ;;  %v371_v4 = vld [vmem:[#allocation5] sm:$0xff]  ;;  %v1170_v5 = vpack.c.bf16 %v450_v3, %v449_v2  ;;  %v372_v6 = vld [vmem:[#allocation5 + $0x8] sm:$0xff]  ;;  %vm375_vm1 = vcmask 261120   ;;  %p362_p6 = scmp.lt.s32.totalorder %s1575_s30, 1 }
  0x9d   : > { %1123 = vmatprep.mubr.msk.f32.mxu1 %vm1510_vm0, %v1511_v1  ;;  %1112 = vmatprep.mubr.msk.f32.mxu0 %vm1510_vm0, %v1511_v1  ;;  %v452_v8 = vld [vmem:[#allocation7 + $0x18] sm:$0xff]  ;;  %v1164_v9 = vpack.c.bf16 %v372_v6, %v371_v4  ;;  %v373_v10 = vld [vmem:[#allocation5 + $0x10] sm:$0xff]  ;;  %v523_v14 = vld [vmem:[#allocation8] sm:$0xff]  ;;  %v676_v27 = vshrl.u32 %v675_v25, 7  ;;  %v1512_v29 = vmov 0   ;;  %vm681_vm4 = vcmask 64512  }
  0x9e   : > { %v374_v11 = vld [vmem:[#allocation5 + $0x18] sm:$0xff]  ;;  %1171 = vmatpush3.bf16.msra.mxu1 %v1170_v5  ;;  %v1173_v12 = vpack.c.bf16 %v452_v8, %v451_v7  ;;  %v524_v15 = vld [vmem:[#allocation8 + $0x8] sm:$0xff]  ;;  %v525_v18 = vld [vmem:[#allocation8 + $0x10] sm:$0xff]  ;;  %s363_s8 = scalar_select %p362_p6, %s1575_s30, 1  ;;  %vm915_vm5 = vcmask 57344   ;;  %vm924_vm6 = vcmask 253952  }
  0x9f   : > { %1165 = vmatpush3.bf16.msra.mxu0 %v1164_v9  ;;  %1172 = vmatprep.subr.bf16.mxu1 %v1509_v0  ;;  %v1167_v13 = vpack.c.bf16 %v374_v11, %v373_v10  ;;  %v365_v16 = vld [vmem:[%s1786_s20] sm:$0xff]  ;;  %v1176_v17 = vpack.c.bf16 %v524_v15, %v523_v14  ;;  %v677_v28 = vsub.s32 0, %v676_v27  ;;  %v367_v49 = vld [vmem:[#allocation10] sm:$0xff]  ;;  %v368_v50 = vld [vmem:[#allocation10 + $0x8] sm:$0xff]  ;;  %s1075_s28 = sshll.u32 %s1575_s30, 4  ;;  %s361_s10 = scalar_lea.vmem [#allocation11], %s1782_s22 }
  0xa0   : > { %1166 = vmatprep.subr.bf16.mxu0 %v1509_v0  ;;  %v526_v19 = vld [vmem:[#allocation8 + $0x18] sm:$0xff]  ;;  %s364_s21 = scalar_lea.vmem %s1894_s1, %s363_s8  ;;  %v369_v51 = vld [vmem:[#allocation10 + $0x10] sm:$0xff]  ;;  %v1182_v52 = vpack.c.bf16 %v368_v50, %v367_v49  ;;  %s939_s16 = sshll.u32 %s361_s10, 4  ;;  %s1851_s16 = int_to_ptr.vmem [resolvable:$true] %s939_s16 }
  0xa1   : > { %v1179_v20 = vpack.c.bf16 %v526_v19, %v525_v18  ;;  %v366_v26 = vld [vmem:[%s364_s21] sm:$0x1]  ;;  %v370_v53 = vld [vmem:[#allocation10 + $0x18] sm:$0xff]  ;;  %s1849_s14 = scalar_lea.hbm %s1900_s7, %s1075_s28  ;;  %s927_s20 = scalar_lea.sflag [#allocation4], %s1782_s22 }
  0xa2   : > { %1174 = vmatpush3.bf16.msra.mxu1 %v1173_v12  ;;  %vm673_vm2 = vcmp.eq.f32.partialorder %v366_v26, 0.0  ;;  %v1185_v54 = vpack.c.bf16 %v370_v53, %v369_v51  ;;  %v916_v57 = vsel %vm915_vm5, %v366_v26, 0.0  ;;  %v920_v62 = vld [vmem:[%s1899_s6] sm:$0x1]  ;;  %s1426_s8 = scalar_lea.vmem %s1851_s16, 16  ;;  %p1918_p7 = scmp.ne.s32.totalorder %s1910_s9, 0 }
  0xa3   : > { %1168 = vmatpush3.bf16.msra.mxu0 %v1167_v13  ;;  %1137 = vmatprep.subr.mxu1 %v1511_v1  ;;  %v674_v30 = vsel %vm673_vm2, 1, %v1512_v29  ;;  %p1427_p5 = scmp.ne.s32.totalorder %s1851_s16, %s1426_s8  ;;  %s1513_s30 = smov [#allocation11]  }
  0xa4   : > { %1175 = vmatprep.subr.bf16.mxu0 %v1509_v0  ;;  %v678_v31 = vrot.slane %v674_v30, %v677_v28  ;;  %917 = vadd.xlane.f32.xlu1 %v916_v57  ;;  %s1430_s23 = sshll.u32 %s1513_s30, 4  ;;  %s1431_s23 = int_to_ptr.vmem [resolvable:$false] %s1430_s23 }
  0xa5   : > { %1124 = vmatmul.mubr.msk.f32.vlgmr.msra.gmra.mrb[0].mxu1 %vm375_vm1, %v365_v16  ;;  %p1428_p9 = pnand %p1427_p5, %p1918_p7  ;;  %s1432_s13 = scalar_lea.vmem %s1431_s23, 32 }
  0xa6   : > { %1113 = vmatmul.mubr.msk.f32.vlgmr.msra.gmra.mrb[0].mxu0 %vm375_vm1, %v365_v16  ;;  %1139 = vmatprep.mubr.msk.f32.mxu1 %vm1510_vm0, %v1511_v1  ;;  %vm679_vm3 = vcmp.eq.s32.totalorder %v678_v31, 1  ;;  %p1433_p3 = scmp.lt.s32.totalorder %s1851_s16, %s1431_s23  ;;  %p1434_p13 = scmp.lt.s32.totalorder %s1432_s13, %s1426_s8 }
  0xa7   : > { %1177 = vmatpush3.bf16.msra.mxu0 %v1176_v17  ;;  %1134 = vmatprep.mubr.msk.f32.mxu0 %vm1510_vm0, %v1511_v1  ;;  %p1429_p12 = pneg %p1428_p9 }
  0xa8   : > { %1178 = vmatprep.subr.bf16.mxu0 %v1509_v0  ;;  %p1435_p0 = por %p1434_p13, %p1433_p3 }
  0xaa   : > { %p1436_p2 = pnand %p1435_p0, %p1429_p12 }
  0xab   : > { %1180 = vmatpush3.bf16.msra.mxu0 %v1179_v20 }
  0xac   : > { %1147 = vmatprep.subr.mxu0 %v1511_v1 }
 0x131   : > { %v918_v60 = vpop.xlane.xlu1 %917 }
 0x132   : > { %v921_v61 = vmul.f32 0.125, %v918_v60 }
 0x134   : > { %v922_v63 = vmul.f32 %v921_v61, %v920_v62 }
 0x178   : > { %v519_v21 = vpop.f32.mrb[0].mxu1 }
 0x179   : > { %v1125_v22 = vpop.f32.mrb[1].mxu1  ;;  %1138 = vmatpush3.xpose.msk.msra.mxu1 %vm375_vm1, %v519_v21  ;;  %v445_v23 = vpop.f32.mrb[0].mxu0 }
 0x17a   : > { %v1114_v24 = vpop.f32.mrb[1].mxu0  ;;  %1135 = vmatmul.mubr.msk.f32.vlgmr.msra.gmra.mrb[2].mxu0 %vm375_vm1, %v445_v23  ;;  %1142 = vmatprep.subr.mxu1 %v1511_v1 }
 0x17b   : > { %1149 = vmatprep.mubr.msk.f32.mxu0 %vm1510_vm0, %v1511_v1 }
 0x17c   : > { %1140 = vmatmul.mubr.msk.f32.vlgmr.msra.gmra.mrb[2].mxu1 %vm375_vm1, %v445_v23 }
 0x17d   : > { %1144 = vmatprep.mubr.msk.f32.mxu1 %vm1510_vm0, %v1511_v1 }
 0x24d   : > { %v596_v32 = vpop.f32.mrb[2].mxu0 }
 0x24e   : > { %v1136_v33 = vpop.f32.mrb[3].mxu0  ;;  %1148 = vmatpush3.msra.mxu0 %v596_v32 }
 0x24f   : > { %v669_v34 = vpop.f32.mrb[2].mxu1 }
 0x250   : > { %v680_v35 = vsel %vm679_vm3, -1e+20, %v669_v34  ;;  %v1141_v36 = vpop.f32.mrb[3].mxu1 }
 0x251   : > { %v682_v37 = vsel %vm681_vm4, %v680_v35, -inf }
 0x252   : > { %683 = vmax.xlane.f32.xlu0 %v682_v37 }
 0x2df   : > { %v684_v38 = vpop.xlane.xlu0 %683 }
 0x2e0   : > { %v685_v39 = vsub.f32 %v680_v35, %v684_v38 }
 0x2e2   : > { %v686_v40 = vmul.f32 1.442695, %v685_v39 }
 0x2e4   : > { %1280 = vpow2.f32 %v686_v40 }
 0x2ee   : > { %v1281_v41 = vpop.eup %1280 }
 0x2ef   : > { %v688_v42 = vsel %vm681_vm4, %v1281_v41, 0.0 }
 0x2f0   : > { %689 = vadd.xlane.f32.xlu0 %v688_v42 }
 0x37d   : > { %v690_v43 = vpop.xlane.xlu0 %689 }
 0x37e   : > { %1282 = vrcp.f32 %v690_v43 }
 0x388   : > { %v1283_v44 = vpop.eup %1282 }
 0x389   : > { %v692_v45 = vmul.f32 %v1283_v44, %v690_v43 }
 0x38b   : > { %v693_v46 = vsub.f32 2.0, %v692_v45 }
 0x38d   : > { %v694_v47 = vmul.f32 %v1283_v44, %v693_v46 }
 0x38f   : > { %v695_v48 = vmul.f32 %v1281_v41, %v694_v47 }
 0x391   : > { %1143 = vmatpush3.msra.mxu1 %v695_v48 }
 0x392   : > { %1145 = vmatmul.mubr.msk.f32.vlgmr.msra.gmra.mrb[4].mxu1 %vm681_vm4, %v366_v26  ;;  %1181 = vmatprep.subr.bf16.mxu1 %v1509_v0 }
 0x393   : > { %1160 = vmatprep.mubr.msk.f32.mxu1 %vm1510_vm0, %v1511_v1  ;;  %1183 = vmatpush3.bf16.msra.mxu1 %v1182_v52 }
 0x394   : > { %1184 = vmatprep.subr.bf16.mxu1 %v1509_v0 }
 0x397   : > { %1186 = vmatpush3.bf16.msra.mxu1 %v1185_v54 }
 0x465   : > { %v765_v55 = vpop.f32.mrb[4].mxu1 }
 0x466   : > { %v1146_v56 = vpop.f32.mrb[5].mxu1  ;;  %1150 = vmatmul.mubr.msk.f32.vlgmr.msra.gmra.mrb[4].mxu0 %vm681_vm4, %v765_v55 }
 0x539   : > { %v838_v58 = vpop.f32.mrb[4].mxu0 }
 0x53a   : > { %v1151_v59 = vpop.f32.mrb[5].mxu0  ;;  %1161 = vmatmul.mubr.msk.f32.vlgmr.msra.gmra.mrb[6].mxu1 %vm375_vm1, %v838_v58 }
 0x60d   : > { %v911_v0 = vpop.f32.mrb[6].mxu1 }
 0x60e   : > { %v919_v1 = vmul.f32 0.125, %v911_v0  ;;  %v1162_v2 = vpop.f32.mrb[7].mxu1 }
 0x610   : > { %v923_v3 = vadd.f32 %v922_v63, %v919_v1 }
 0x612   : > { %925 = vst.msk [vmem:[%s361_s10] sm:$0x1] %vm924_vm6, %v923_v3 }
 0x613   : > { %1439 = shalt.err (!%p1436_p2)
}
 0x614   : > { %s1440_s22 = scalar_lea.hbm %s1849_s14, 16  ;;  %s1444_s29 = scalar_lea.hbm %s1900_s7, 32 }
 0x615   : > { %p1441_p8 = scmp.ne.s32.totalorder %s1849_s14, %s1440_s22  ;;  %p1445_p11 = scmp.lt.u32.totalorder %s1849_s14, %s1900_s7 }
 0x616   : > { %p1446_p1 = scmp.lt.u32.totalorder %s1444_s29, %s1440_s22  ;;  %p1448_p5 = scmp.lt.u32.totalorder %s1440_s22, %s1849_s14 }
 0x617   : > { %p1442_p4 = pnand %p1441_p8, %p1918_p7 }
 0x618   : > { %p1447_p6 = por %p1446_p1, %p1445_p11 }
 0x619   : > { %p1443_p10 = pneg %p1442_p4 }
 0x61a   : > { %p1449_p9 = por %p1448_p5, %p1447_p6 }
 0x61c   : > { %p1450_p12 = pnand %p1449_p9, %p1443_p10 }
 0x61e   : > { %1453 = shalt.err (!%p1450_p12)
}
 0x61f   : > { %1205 = dma.vmem_to_hbm [thread:$0]  (%p1918_p7), %s1851_s16, 16, %s1849_s14, %s927_s20  }
 0x620 PF: > { %s951_s17 = sand.u32 1, %s1488_s24   ;;  %p1919_p3 = scmp.ne.s32.totalorder %s1911_s15, 0 }
 0x621   : > { %p1920_p13 = scmp.ge.s32.totalorder %s1500_s27, 2  ;;  %s952_s18 = scalar_lea.sflag [#allocation4], %s951_s17 }
 0x623   : > { %p1225_p0 = pnand %p1920_p13, %p1919_p3 }
 0x625   : > { %1483 = dma.done.wait (!%p1225_p0), %s952_s18, 16  }
 0x626   : > { %1485 = vsyncadd (!%p1225_p0), %s952_s18, 4294967280  ;;  %p22_p2 = scmp.ge.s32.totalorder %s1706_s19, 4   ;;  %s1921_s24 = smov %s1492_s25 }
 0x627   : > { %s1922_s25 = smov %s1496_s26  ;;  %s1923_s26 = smov %s1717_s12 }
 0x628   : > { %s1924_s27 = smov %s1706_s19  ;;  %24 = sbr.rel (!%p22_p2) target bundleno = 7 (0x7), region = 112 }
 0x62f   :  { %956 = vsyncpa [#allocation3], 1 }
 0x630   :  { %958 = vsyncpa [#allocation3 + $0x1], 1 }
 0x631   :  { %959 = vsyncpa [#allocation6], 1 }
 0x632   :  { %960 = vsyncpa [#allocation9], 1 }
 0x633   :  { %961 = vsyncpa [#allocation4], 1 }
 0x634   :  { %963 = vsyncpa [#allocation4 + $0x1], 1 }

</bundles_post_ra>
